<compile_context>
chip_gen: v6e
topology: v6e:2x2x1
jax: 0.10.0
libtpu: 0.0.40
codegen_flags: <defaults>
</compile_context>

<pallas_src>
import math
import functools

import jax
import jax.numpy as jnp
from jax.experimental import pallas as pl
from jax.experimental.pallas import tpu as pltpu


_VMEM_TILE_BUDGET = 20 * 1024 * 1024   # double-buffered A + W + out working set
_VMEM_LIMIT_BYTES = 32 * 1024 * 1024   # safe scoped-VMEM limit on v5e/v6e/v7x


def _round_up(x, m):
    return ((x + m - 1) // m) * m


def _choose_gemm_tiles(M, Kp, Op, budget=_VMEM_TILE_BUDGET):
    """Pick (tm, tn, tk). Preference order: tn == Op (A streamed once), then
    tk == Kp (weight resident, fewer accumulator read-modify-writes), then the
    largest tm that keeps the double-buffered working set under the budget."""
    def cost(tm, tn, tk):
        # 2 pipeline buffers each: A bf16, W bf16, out f32.
        return 2 * tm * tk * 2 + 2 * tk * tn * 2 + 2 * tm * tn * 4

    m_cap = _round_up(M, 8)
    tn_cands = [Op] + [c for c in (512, 256, 128) if c < Op and Op % c == 0]
    tk_cands = [Kp] + [c for c in (2048, 1024, 512, 256, 128)
                       if c < Kp and Kp % c == 0]
    tm_cands = [1024, 512, 256, 128]
    for tn in tn_cands:
        for tk in tk_cands:
            for tm in tm_cands:
                tm_e = min(tm, m_cap)
                if cost(tm_e, tn, tk) <= budget:
                    return tm_e, tn, tk
    return min(128, m_cap), tn_cands[-1], tk_cands[-1]


# ----------------------- STE.forward (weight quantization) -----------------------
def _quant_kernel(ab_ref, w_ref, wq_ref, *, step):
    # ab_ref: (2,) f32 in SMEM -> [alpha (guarded nonzero), beta]
    w = w_ref[...]
    alpha = ab_ref[0]
    beta = ab_ref[1]
    mask = (w != 0.0).astype(jnp.float32)      # pruned (exact-zero) & pad stay zero
    ws = (w - beta) / alpha
    r = jnp.round(step * ws) / step            # torch.round == half-to-even
    wq_ref[...] = ((alpha * r + beta) * mask).astype(wq_ref.dtype)


def quantize_weight_t(w2d, Kp, Op, bit, symmetric, out_dtype=jnp.bfloat16):
    """w2d: (O, K) f32 -> quantized, zero-padded (Kp, Op) weight, already in the
    GEMM's (k, n) layout so the inner loop needs no transpose."""
    O, K = w2d.shape
    wt = jnp.pad(w2d.T, ((0, Kp - K), (0, Op - O)))          # (Kp, Op) f32
    if bit is None:
        return wt.astype(out_dtype)
    if bit == 0:
        return jnp.zeros((Kp, Op), out_dtype)

    # Global scale/offset: tiny reductions over the (unpadded) weight, plain JAX.
    if symmetric:
        mx = jnp.max(jnp.abs(w2d))
        beta = -mx
        alpha = 2.0 * mx
    else:
        wmax = jnp.max(w2d)
        # exact zeros are excluded from the min, matching STE.forward
        beta = jnp.min(jnp.where(w2d == 0.0, wmax, w2d))
        alpha = wmax - beta
    alpha = jnp.where(alpha == 0.0, 1.0, alpha)               # guard: 0/0 -> NaN
    ab = jnp.stack([alpha, beta]).astype(jnp.float32)

    tk = Kp if Kp <= 512 else next(
        (c for c in (512, 256, 128, 64, 32, 16, 8) if Kp % c == 0), Kp)
    to = Op if Op <= 512 else next(
        (c for c in (512, 256, 128) if Op % c == 0), Op)
    kern = functools.partial(_quant_kernel, step=float(2 ** bit - 1))
    return pl.pallas_call(
        kern,
        out_shape=jax.ShapeDtypeStruct((Kp, Op), out_dtype),
        grid=(Kp // tk, Op // to),
        in_specs=[
            pl.BlockSpec(memory_space=pltpu.MemorySpace.SMEM),   # alpha/beta scalars
            pl.BlockSpec((tk, to), lambda i, j: (i, j)),
        ],
        out_specs=pl.BlockSpec((tk, to), lambda i, j: (i, j)),
        compiler_params=pltpu.CompilerParams(
            dimension_semantics=("parallel", "parallel")),
    )(ab, wt)


# ----------------------------- conv GEMM hot path -----------------------------
def _conv_gemm_kernel(a_ref, w_ref, o_ref):
    k = pl.program_id(2)
    # A: (tm, tk) bf16, W: (tk, tn) bf16 -> canonical (m,k)x(k,n) MXU contraction.
    prod = jax.lax.dot_general(
        a_ref[...], w_ref[...],
        dimension_numbers=(((1,), (0,)), ((), ())),
        preferred_element_type=jnp.float32)

    # Output block index (i, j) is constant across k -> o_ref (fp32) is resident;
    # accumulate into it directly (no scratch accumulator, no epilogue copy).
    @pl.when(k == 0)
    def _():
        o_ref[...] = prod

    @pl.when(k > 0)
    def _():
        o_ref[...] += prod


def fp_conv2d(x, weight, *, stride=1, padding=0, Nbits=None, symmetric=False):
    """FP_Conv.forward: conv2d(x, STE(weight, Nbits, symmetric)), bias=False.

    x:      (N, C, H, W)   float32  (NCHW, PyTorch convention)
    weight: (O, C, KH, KW) float32
    returns (N, O, OH, OW) float32
    """
    N, C, H, W = x.shape
    O, _, KH, KW = weight.shape
    K = C * KH * KW

    OH = (H + 2 * padding - KH) // stride + 1
    OW = (W + 2 * padding - KW) // stride + 1
    M = N * OH * OW

    # Pad sizes: lane-dense Op; for small K skip the 128-pad (round to 16 only,
    # for bf16 sublane packing) to avoid inflating the im2col buffer / A traffic.
    Op = _round_up(O, 128)
    Kp = _round_up(K, 16) if K < 128 else _round_up(K, 128)

    tm, tn, tk = _choose_gemm_tiles(M, Kp, Op)
    Mp = _round_up(M, tm)
    # Megacore (v7x): make sure the parallel grid extent is >= 2 when possible.
    while (Mp // tm) * (Op // tn) < 2 and tm % 16 == 0 and M > tm // 2:
        tm //= 2
        Mp = _round_up(M, tm)

    # Quantized, padded, bf16 weight directly in the GEMM's (Kp, Op) layout.
    wq = quantize_weight_t(weight.reshape(O, K), Kp, Op, Nbits, symmetric)

    # im2col patches in NHWC; output feature order is (c, kh, kw), matching
    # PyTorch's weight.view(O, -1) flattening (validated against lax.conv below).
    # TODO(synk): patch extraction and the NHWC<->NCHW transposes remain XLA
    # layout plumbing outside the kernel; fusing the shifted-window gather into
    # the Pallas kernel would require manual per-(kh,kw) DMA.
    x_nhwc = jnp.transpose(x, (0, 2, 3, 1)).astype(jnp.bfloat16)
    patches = jax.lax.conv_general_dilated_patches(
        x_nhwc, filter_shape=(KH, KW), window_strides=(stride, stride),
        padding=((padding, padding), (padding, padding)),
        dimension_numbers=("NHWC", "HWIO", "NHWC"))
    A = patches.reshape(M, K)
    if (Mp, Kp) != (M, K):
        A = jnp.pad(A, ((0, Mp - M), (0, Kp - K)))

    out = pl.pallas_call(
        _conv_gemm_kernel,
        out_shape=jax.ShapeDtypeStruct((Mp, Op), jnp.float32),
        grid=(Mp // tm, Op // tn, Kp // tk),
        in_specs=[
            pl.BlockSpec((tm, tk), lambda i, j, k: (i, k)),
            pl.BlockSpec((tk, tn), lambda i, j, k: (k, j)),
        ],
        out_specs=pl.BlockSpec((tm, tn), lambda i, j, k: (i, j)),
        compiler_params=pltpu.CompilerParams(
            dimension_semantics=("parallel", "parallel", "arbitrary"),
            vmem_limit_bytes=_VMEM_LIMIT_BYTES),
    )(A, wq)

    y = out[:M, :O].reshape(N, OH, OW, O)
    return jnp.transpose(y, (0, 3, 1, 2))   # back to NCHW


# ----------------------------- reference (for self-check) -----------------------------
def _ref_quant(w, bit, symmetric):
    if bit is None:
        return w
    if bit == 0:
        return w * 0.0
    mask = jnp.where(w != 0.0, 1.0, 0.0)
    if symmetric:
        mx = jnp.max(jnp.abs(w))
        beta, alpha = -mx, 2.0 * mx
    else:
        wmax = jnp.max(w)
        beta = jnp.min(jnp.where(mask == 0.0, wmax, w))
        alpha = wmax - beta
    step = float(2 ** bit - 1)
    R = jnp.round(step * (w - beta) / alpha) / step
    return (alpha * R + beta) * mask


def _ref_forward(x, w, stride, padding, Nbits, symmetric):
    # Same numerics as the Pallas path: bf16 operands, fp32 accumulation.
    wq = _ref_quant(w, Nbits, symmetric)
    return jax.lax.conv_general_dilated(
        x.astype(jnp.bfloat16), wq.astype(jnp.bfloat16),
        window_strides=(stride, stride),
        padding=((padding, padding), (padding, padding)),
        dimension_numbers=("NCHW", "OIHW", "NCHW"),
        preferred_element_type=jnp.float32)


if __name__ == "__main__":
    # FP_Conv(in_channels=4, out_channels=8, kernel_size=3, stride=1, padding=1,
    #         bias=False, Nbits=4, symmetric=False)
    in_channels, out_channels, kernel_size = 4, 8, 3
    stride, padding, Nbits, symmetric = 1, 1, 4, False

    key = jax.random.PRNGKey(0)
    kw_key, kx_key = jax.random.split(key)

    n = kernel_size * kernel_size * out_channels
    m = kernel_size * kernel_size * in_channels
    std = math.sqrt(2.0 / (n + m))
    weight = std * jax.random.normal(
        kw_key, (out_channels, in_channels, kernel_size, kernel_size),
        dtype=jnp.float32)

    x = jax.random.normal(kx_key, (2, 4, 16, 16), dtype=jnp.float32)

    conv_fn = jax.jit(functools.partial(
        fp_conv2d, stride=stride, padding=padding,
        Nbits=Nbits, symmetric=symmetric))
    y = conv_fn(x, weight)
    jax.block_until_ready(y)
    y_ref = _ref_forward(x, weight, stride, padding, Nbits, symmetric)
    assert y.shape == (2, out_channels, 16, 16)
    assert jnp.allclose(y, y_ref, atol=2e-3, rtol=2e-3), float(
        jnp.max(jnp.abs(y - y_ref)))

    # Second config: symmetric 2-bit quantization, stride 2, no padding
    # (exercises the ragged-M tile and a second tiling plan).
    conv_fn2 = jax.jit(functools.partial(
        fp_conv2d, stride=2, padding=0, Nbits=2, symmetric=True))
    y2 = conv_fn2(x, weight)
    jax.block_until_ready(y2)
    y2_ref = _ref_forward(x, weight, 2, 0, 2, True)
    assert jnp.allclose(y2, y2_ref, atol=2e-3, rtol=2e-3), float(
        jnp.max(jnp.abs(y2 - y2_ref)))

    print("KERNEL_OK")
</pallas_src>

<mosaic_0001>
module attributes {stable_mosaic.version = 11 : i64} {
  func.func @_quant_kernel(%arg0: i32, %arg1: i32, %arg2: memref<2xf32, #tpu.memory_space<smem>>, %arg3: memref<48x128xf32, #tpu.memory_space<vmem>>, %arg4: memref<48x128xbf16, #tpu.memory_space<vmem>>) attributes {dimension_semantics = [#tpu.dimension_semantics<parallel>, #tpu.dimension_semantics<parallel>], iteration_bounds = array<i64: 1, 1>, scalar_prefetch = 0 : i64, scratch_operands = 0 : i64, tpu.core_type = #tpu.core_type<tc>, window_params = [{transform_indices = @transform_0, window_bounds = array<i64: 2>}, {transform_indices = @transform_1, window_bounds = array<i64: 48, 128>}, {transform_indices = @transform_2, window_bounds = array<i64: 48, 128>}]} {
    %c0 = arith.constant 0 : index
    %c0_0 = arith.constant 0 : index
    %0 = vector.load %arg3[%c0, %c0_0] : memref<48x128xf32, #tpu.memory_space<vmem>>, vector<48x128xf32>
    %c0_1 = arith.constant 0 : index
    %1 = memref.load %arg2[%c0_1] : memref<2xf32, #tpu.memory_space<smem>>
    %c1 = arith.constant 1 : index
    %2 = memref.load %arg2[%c1] : memref<2xf32, #tpu.memory_space<smem>>
    %cst = arith.constant 0.000000e+00 : f32
    %3 = vector.broadcast %cst : f32 to vector<48x128xf32>
    %4 = arith.cmpf one, %0, %3 : vector<48x128xf32>
    %5 = arith.extui %4 : vector<48x128xi1> to vector<48x128xi32>
    %6 = arith.sitofp %5 : vector<48x128xi32> to vector<48x128xf32>
    %7 = vector.broadcast %2 : f32 to vector<48x128xf32>
    %8 = arith.subf %0, %7 : vector<48x128xf32>
    %9 = vector.broadcast %1 : f32 to vector<48x128xf32>
    %10 = arith.divf %8, %9 : vector<48x128xf32>
    %cst_2 = arith.constant 1.500000e+01 : f32
    %11 = vector.broadcast %cst_2 : f32 to vector<48x128xf32>
    %12 = arith.mulf %11, %10 : vector<48x128xf32>
    %13 = math.roundeven %12 : vector<48x128xf32>
    %cst_3 = arith.constant 1.500000e+01 : f32
    %14 = vector.broadcast %cst_3 : f32 to vector<48x128xf32>
    %15 = arith.divf %13, %14 : vector<48x128xf32>
    %16 = vector.broadcast %1 : f32 to vector<48x128xf32>
    %17 = arith.mulf %16, %15 : vector<48x128xf32>
    %18 = vector.broadcast %2 : f32 to vector<48x128xf32>
    %19 = arith.addf %17, %18 : vector<48x128xf32>
    %20 = arith.mulf %19, %6 : vector<48x128xf32>
    %21 = arith.truncf %20 : vector<48x128xf32> to vector<48x128xbf16>
    %c0_4 = arith.constant 0 : index
    %c0_5 = arith.constant 0 : index
    %22 = vector.load %arg4[%c0_4, %c0_5] : memref<48x128xbf16, #tpu.memory_space<vmem>>, vector<48x128xbf16>
    tpu.vector_store %arg4[%c0_4, %c0_5], %21 {strides = array<i32>} : memref<48x128xbf16, #tpu.memory_space<vmem>>, vector<48x128xbf16>,
    return
  }
  func.func @transform_0(%arg0: i32, %arg1: i32) -> i32 {
    %c0_i32 = arith.constant 0 : i32
    %c0_i32_0 = arith.constant 0 : i32
    return %c0_i32 : i32
  }
  func.func @transform_1(%arg0: i32, %arg1: i32) -> (i32, i32) {
    %c0_i32 = arith.constant 0 : i32
    return %arg0, %arg1 : i32, i32
  }
  func.func @transform_2(%arg0: i32, %arg1: i32) -> (i32, i32) {
    %c0_i32 = arith.constant 0 : i32
    return %arg0, %arg1 : i32, i32
  }
}

module attributes {stable_mosaic.version = 11 : i64} {
  func.func @_conv_gemm_kernel(%arg0: i32, %arg1: i32, %arg2: i32, %arg3: memref<256x48xbf16, #tpu.memory_space<vmem>>, %arg4: memref<48x128xbf16, #tpu.memory_space<vmem>>, %arg5: memref<256x128xf32, #tpu.memory_space<vmem>>) attributes {dimension_semantics = [#tpu.dimension_semantics<parallel>, #tpu.dimension_semantics<parallel>, #tpu.dimension_semantics<arbitrary>], iteration_bounds = array<i64: 2, 1, 1>, scalar_prefetch = 0 : i64, scratch_operands = 0 : i64, tpu.core_type = #tpu.core_type<tc>, window_params = [{transform_indices = @transform_0, window_bounds = array<i64: 256, 48>}, {transform_indices = @transform_1, window_bounds = array<i64: 48, 128>}, {transform_indices = @transform_2, window_bounds = array<i64: 256, 128>}]} {
    %c0 = arith.constant 0 : index
    %c0_0 = arith.constant 0 : index
    %0 = vector.load %arg3[%c0, %c0_0] : memref<256x48xbf16, #tpu.memory_space<vmem>>, vector<256x48xbf16>
    %c0_1 = arith.constant 0 : index
    %c0_2 = arith.constant 0 : index
    %1 = vector.load %arg4[%c0_1, %c0_2] : memref<48x128xbf16, #tpu.memory_space<vmem>>, vector<48x128xbf16>
    %cst = arith.constant dense<0.000000e+00> : vector<256x128xf32>
    %2 = tpu.matmul %0, %1, %cst {dimension_numbers = #tpu.dot_dimension_numbers<[1], [0], [0], [1], [0, 0, 1, 1], [], []>} : vector<256x48xbf16>, vector<48x128xbf16>, vector<256x128xf32> -> vector<256x128xf32>
    %c0_i32 = arith.constant 0 : i32
    %3 = arith.cmpi eq, %arg2, %c0_i32 : i32
    %4 = arith.extui %3 : i1 to i32
    %c0_i32_3 = arith.constant 0 : i32
    %5 = arith.cmpi ne, %4, %c0_i32_3 : i32
    scf.if %5 {
      %c0_6 = arith.constant 0 : index
      %c0_7 = arith.constant 0 : index
      %9 = vector.load %arg5[%c0_6, %c0_7] : memref<256x128xf32, #tpu.memory_space<vmem>>, vector<256x128xf32>
      tpu.vector_store %arg5[%c0_6, %c0_7], %2 {strides = array<i32>} : memref<256x128xf32, #tpu.memory_space<vmem>>, vector<256x128xf32>,
    } else {
    }
    %c0_i32_4 = arith.constant 0 : i32
    %6 = arith.cmpi sgt, %arg2, %c0_i32_4 : i32
    %7 = arith.extui %6 : i1 to i32
    %c0_i32_5 = arith.constant 0 : i32
    %8 = arith.cmpi ne, %7, %c0_i32_5 : i32
    scf.if %8 {
      %c0_6 = arith.constant 0 : index
      %c0_7 = arith.constant 0 : index
      %9 = vector.load %arg5[%c0_6, %c0_7] : memref<256x128xf32, #tpu.memory_space<vmem>>, vector<256x128xf32>
      %10 = arith.addf %9, %2 : vector<256x128xf32>
      %c0_8 = arith.constant 0 : index
      %c0_9 = arith.constant 0 : index
      %11 = vector.load %arg5[%c0_8, %c0_9] : memref<256x128xf32, #tpu.memory_space<vmem>>, vector<256x128xf32>
      tpu.vector_store %arg5[%c0_8, %c0_9], %10 {strides = array<i32>} : memref<256x128xf32, #tpu.memory_space<vmem>>, vector<256x128xf32>,
    } else {
    }
    return
  }
  func.func @transform_0(%arg0: i32, %arg1: i32, %arg2: i32) -> (i32, i32) {
    %c0_i32 = arith.constant 0 : i32
    return %arg0, %arg2 : i32, i32
  }
  func.func @transform_1(%arg0: i32, %arg1: i32, %arg2: i32) -> (i32, i32) {
    %c0_i32 = arith.constant 0 : i32
    return %arg2, %arg1 : i32, i32
  }
  func.func @transform_2(%arg0: i32, %arg1: i32, %arg2: i32) -> (i32, i32) {
    %c0_i32 = arith.constant 0 : i32
    return %arg0, %arg1 : i32, i32
  }
}

</mosaic_0001>

<bundles_post_ra>
// kernel: fp_conv2d.2
= control target key start
LH: loop header
LB: loop body
LE: loop exit
PB: predicated region body
PF: predicated region fallthrough
CT: control target
= control target key end

     0   :  { %7 = vsyncpa [#allocation3], 0  ;;  %s377_s0 = inlined_call_operand.vmem [shape: f32[2], index: 0, kind: input, shape index: {}]   ;;  %s378_s1 = inlined_call_operand.vmem [shape: f32[48,128], index: 1, kind: input, shape index: {}]   ;;  %s379_s2 = inlined_call_operand.vmem [shape: bf16[48,128], index: 2, kind: output, shape index: {}]  }
   0x1   :  { %s14_s11 = sshll.u32 %s377_s0, 4  ;;  %s15_s11 = int_to_ptr.vmem [resolvable:$true] %s14_s11 }
   0x2   :  { %s225_s12 = scalar_lea.vmem %s15_s11, 16  ;;  %p230_p1 = scmp.lt.s32.totalorder %s15_s11, %s15_s11 }
   0x3   :  { %p226_p0 = scmp.ne.s32.totalorder %s15_s11, %s225_s12  ;;  %p231_p2 = scmp.lt.s32.totalorder %s225_s12, %s225_s12 }
   0x5   :  { %p232_p3 = por %p231_p2, %p230_p1 }
   0x7   :  { %p233_p4 = pnand %p232_p3, %p226_p0 }
   0x9   :  { %236 = shalt.err (!%p233_p4)
}
   0xa   :  { %s239_s13 = smov [#allocation2]  }
   0xb   :  { %17 = dma.vmem_to_smem %s15_s11, 16, %s239_s13, [#allocation3]  }
   0xc   :  { %237 = dma.done.wait [#allocation3], 16  }
   0xd   :  { %238 = vsyncadd [#allocation3], 4294967280 }
   0xe   :  { %23 = sfence }
   0xf   :  { %s30_s14 = sld [smem:[#allocation2]]  ;;  %v24_v1 = vld [vmem:[%s378_s1] sm:$0xff]  ;;  %v25_v2 = vld [vmem:[%s378_s1 + $0x8] sm:$0xff]  ;;  %v273_v4 = vld [vmem:[%s378_s1 + $0x10] sm:$0xff]  ;;  %v240_v24 = vmov 0.0  }
  0x10   :  { %s137_s15 = sld [smem:[#allocation2 + $0x1]]  ;;  %v278_v5 = vld [vmem:[%s378_s1 + $0x18] sm:$0xff]  ;;  %v283_v6 = vld [vmem:[%s378_s1 + $0x20] sm:$0xff]  ;;  %v288_v7 = vld [vmem:[%s378_s1 + $0x28] sm:$0xff]  ;;  %vm32_vm0 = vcmp.ne.f32.partialorder %v24_v1, 0.0  ;;  %vm33_vm1 = vcmp.ne.f32.partialorder %v25_v2, 0.0 }
  0x11   :  { %v301_v25 = vsel %vm32_vm0, 1.0, %v240_v24  ;;  %v304_v26 = vsel %vm33_vm1, 1.0, %v240_v24  ;;  %vm34_vm2 = vcmp.ne.f32.partialorder %v273_v4, 0.0  ;;  %vm35_vm5 = vcmp.ne.f32.partialorder %v278_v5, 0.0 }
  0x12   :  { %vm36_vm10 = vcmp.ne.f32.partialorder %v283_v6, 0.0  ;;  %vm37_vm11 = vcmp.ne.f32.partialorder %v288_v7, 0.0 }
  0x15   :  { %v259_v0 = vstv %s30_s14 }
  0x16   :  { %223 = vrcp.f32 %v259_v0  ;;  %v268_v3 = vstv %s137_s15 }
  0x17   :  { %v51_v8 = vsub.f32 %v24_v1, %v268_v3  ;;  %v52_v9 = vsub.f32 %v25_v2, %v268_v3  ;;  %v53_v10 = vsub.f32 %v273_v4, %v268_v3  ;;  %v54_v11 = vsub.f32 %v278_v5, %v268_v3 }
  0x18   :  { %v55_v12 = vsub.f32 %v283_v6, %v268_v3  ;;  %v56_v13 = vsub.f32 %v288_v7, %v268_v3 }
  0x23   :  { %v224_v14 = vpop.eup %223 }
  0x24   :  { %v59_v15 = vmul.f32 %v224_v14, %v51_v8  ;;  %v60_v16 = vmul.f32 %v224_v14, %v52_v9  ;;  %v61_v17 = vmul.f32 %v224_v14, %v53_v10  ;;  %v62_v18 = vmul.f32 %v224_v14, %v54_v11 }
  0x25   :  { %v63_v19 = vmul.f32 %v224_v14, %v55_v12  ;;  %v64_v20 = vmul.f32 %v224_v14, %v56_v13 }
  0x26   :  { %v65_v21 = vmul.f32 15.0, %v59_v15  ;;  %v66_v22 = vmul.f32 15.0, %v60_v16  ;;  %v67_v23 = vmul.f32 15.0, %v61_v17  ;;  %v68_v27 = vmul.f32 15.0, %v62_v18 }
  0x27   :  { %v69_v31 = vmul.f32 15.0, %v63_v19  ;;  %v307_v35 = vmul.f32 15.0, %v64_v20  ;;  %v140_v19 = vsel %vm34_vm2, 1.0, %v240_v24 }
  0x28   :  { %v173_v28 = vand.u32 2147483647, %v65_v21  ;;  %v175_v29 = vcvt.f32.s32 %v65_v21  ;;  %v181_v30 = vand.u32 2147483647, %v66_v22  ;;  %v183_v32 = vcvt.f32.s32 %v66_v22 }
  0x29   :  { %v189_v33 = vand.u32 2147483647, %v67_v23  ;;  %v191_v34 = vcvt.f32.s32 %v67_v23  ;;  %v178_v38 = vand.u32 2147483648, %v65_v21  ;;  %v186_v39 = vand.u32 2147483648, %v66_v22 }
  0x2a   :  { %vm309_vm3 = vcmp.lt.f32.partialorder %v173_v28, 8388608.0  ;;  %v176_v37 = vcvt.s32.f32 %v175_v29  ;;  %v184_v40 = vcvt.s32.f32 %v183_v32  ;;  %v194_v42 = vand.u32 2147483648, %v67_v23 }
  0x2b   :  { %v192_v41 = vcvt.s32.f32 %v191_v34  ;;  %v197_v43 = vand.u32 2147483647, %v68_v27  ;;  %vm313_vm4 = vcmp.lt.f32.partialorder %v181_v30, 8388608.0  ;;  %v199_v46 = vcvt.f32.s32 %v68_v27 }
  0x2c   :  { %v177_v44 = vand.u32 2147483647, %v176_v37  ;;  %v205_v47 = vand.u32 2147483647, %v69_v31  ;;  %v185_v48 = vand.u32 2147483647, %v184_v40  ;;  %v207_v51 = vcvt.f32.s32 %v69_v31 }
  0x2d   :  { %vm318_vm6 = vcmp.lt.f32.partialorder %v189_v33, 8388608.0  ;;  %v193_v50 = vand.u32 2147483647, %v192_v41  ;;  %vm322_vm7 = vcmp.lt.f32.partialorder %v197_v43, 8388608.0  ;;  %v200_v54 = vcvt.s32.f32 %v199_v46 }
  0x2e   :  { %v179_v52 = vor.u32 %v178_v38, %v177_v44  ;;  %v202_v55 = vand.u32 2147483648, %v68_v27  ;;  %v187_v56 = vor.u32 %v186_v39, %v185_v48  ;;  %v208_v58 = vcvt.s32.f32 %v207_v51 }
  0x2f   :  { %v195_v57 = vor.u32 %v194_v42, %v193_v50  ;;  %v210_v59 = vand.u32 2147483648, %v69_v31  ;;  %v201_v61 = vand.u32 2147483647, %v200_v54  ;;  %vm328_vm8 = vcmp.lt.f32.partialorder %v205_v47, 8388608.0 }
  0x30   :  { %v180_v60 = vsel %vm309_vm3, %v179_v52, %v65_v21  ;;  %v215_v63 = vcvt.f32.s32 %v307_v35  ;;  %v188_v1 = vsel %vm313_vm4, %v187_v56, %v66_v22  ;;  %v209_v9 = vand.u32 2147483647, %v208_v58 }
  0x31   :  { %v78_v2 = vmul.f32 0.06666667, %v180_v60  ;;  %v196_v8 = vsel %vm318_vm6, %v195_v57, %v67_v23  ;;  %v79_v10 = vmul.f32 0.06666667, %v188_v1  ;;  %v203_v11 = vor.u32 %v202_v55, %v201_v61 }
  0x32   :  { %v80_v12 = vmul.f32 0.06666667, %v196_v8  ;;  %v213_v13 = vand.u32 2147483647, %v307_v35  ;;  %v211_v15 = vor.u32 %v210_v59, %v209_v9  ;;  %v216_v16 = vcvt.s32.f32 %v215_v63 }
  0x33   :  { %v84_v14 = vmul.f32 %v78_v2, %v259_v0  ;;  %v218_v17 = vand.u32 2147483648, %v307_v35  ;;  %v85_v18 = vmul.f32 %v79_v10, %v259_v0  ;;  %v204_v20 = vsel %vm322_vm7, %v203_v11, %v68_v27 }
  0x34   :  { %v86_v21 = vmul.f32 %v80_v12, %v259_v0  ;;  %v81_v23 = vmul.f32 0.06666667, %v204_v20  ;;  %v212_v28 = vsel %vm328_vm8, %v211_v15, %v69_v31  ;;  %v217_v29 = vand.u32 2147483647, %v216_v16 }
  0x35   :  { %v90_v22 = vadd.f32 %v84_v14, %v268_v3  ;;  %v91_v30 = vadd.f32 %v85_v18, %v268_v3  ;;  %vm214_vm9 = vcmp.lt.f32.partialorder %v213_v13, 8388608.0  ;;  %v82_v33 = vmul.f32 0.06666667, %v212_v28 }
  0x36   :  { %v92_v32 = vadd.f32 %v86_v21, %v268_v3  ;;  %v87_v34 = vmul.f32 %v81_v23, %v259_v0  ;;  %v219_v27 = vor.u32 %v218_v17, %v217_v29  ;;  %v141_v37 = vsel %vm35_vm5, 1.0, %v240_v24 }
  0x37   :  { %v96_v4 = vmul.f32 %v301_v25, %v90_v22  ;;  %v97_v36 = vmul.f32 %v304_v26, %v91_v30  ;;  %v88_v31 = vmul.f32 %v82_v33, %v259_v0  ;;  %v142_v43 = vsel %vm36_vm10, 1.0, %v240_v24 }
  0x38   :  { %v93_v38 = vadd.f32 %v87_v34, %v268_v3  ;;  %v98_v39 = vmul.f32 %v140_v19, %v92_v32  ;;  %v220_v40 = vsel %vm214_vm9, %v219_v27, %v307_v35  ;;  %v143_v44 = vsel %vm37_vm11, 1.0, %v240_v24 }
  0x39   :  { %v159_v41 = vpack.c.bf16 %v97_v36, %v96_v4  ;;  %v83_v25 = vmul.f32 0.06666667, %v220_v40  ;;  %v94_v42 = vadd.f32 %v88_v31, %v268_v3 }
  0x3a   :  { %v99_v26 = vmul.f32 %v141_v37, %v93_v38 }
  0x3b   :  { %160 = vst [vmem:[%s379_s2] sm:$0xff] %v159_v41   ;;  %v89_v5 = vmul.f32 %v83_v25, %v259_v0  ;;  %v100_v45 = vmul.f32 %v142_v43, %v94_v42 }
  0x3c   :  { %v164_v6 = vpack.c.bf16 %v99_v26, %v98_v39 }
  0x3d   :  { %v95_v35 = vadd.f32 %v89_v5, %v268_v3 }
  0x3e   :  { %171 = vst [vmem:[%s379_s2 + $0x8] sm:$0xff] %v164_v6  }
  0x3f   :  { %v101_v7 = vmul.f32 %v143_v44, %v95_v35 }
  0x41   :  { %v169_v46 = vpack.c.bf16 %v101_v7, %v100_v45 }
  0x43   :  { %172 = vst [vmem:[%s379_s2 + $0x10] sm:$0xff] %v169_v46  }
  0x44   :  { %136 = vsyncpa [#allocation3], 1 }

// kernel: fp_conv2d.3
= control target key start
LH: loop header
LB: loop body
LE: loop exit
PB: predicated region body
PF: predicated region fallthrough
CT: control target
= control target key end

     0   :  { %s992_s9 = smov 0   ;;  %s994_s10 = smov 0   ;;  %s1106_s0 = inlined_call_operand.vmem [shape: bf16[512,48], index: 0, kind: input, shape index: {}]   ;;  %s1107_s1 = inlined_call_operand.vmem [shape: bf16[48,128], index: 1, kind: input, shape index: {}]   ;;  %s1108_s2 = inlined_call_operand.vmem [shape: f32[512,128], index: 2, kind: output, shape index: {}]  }
   0x1   :  { %s996_s11 = smov 0  }
   0x2 LB: > { %s31_s12 = sadd.s32 1, %s971_s10  ;;  %p805_p0 = scmp.ge.s32.totalorder %s975_s11, 1  ;;  %s975_s11 = sphi %s996_s11, %s12_s11   ;;  %s971_s10 = sphi %s994_s10, %s1110_s10   ;;  %s967_s9 = sphi %s992_s9, %s1109_s9  }
   0x3   : > { %p33_p1 = scmp.ge.s32.totalorder %s31_s12, 2  ;;  %p155_p2 = scmp.lt.s32.totalorder %s975_s11, 3 }
   0x5   : > { %s1112_s12 = smov (%p33_p1, %s31_s12), 0  ;;  %p156_p3 = pnand %p805_p0, %p155_p2 }
   0x6   : > { %s806_s15 = sshll.u32 (!%p156_p3), %s967_s9, 5 }
   0x7   : > { %159 = sbr.rel (%p156_p3) target bundleno = 249 (0xf9), region = 28  ;;  %p192_p4 = scmp.lt.s32.totalorder (!%p156_p3), %s806_s15, 63 }
   0xc   : > { %v934_v0 = vld [vmem:[%s1107_s1 + $0x10] sm:$0xff]   ;;  %v935_v1 = vld [vmem:[%s1107_s1 + $0x8] sm:$0xff]   ;;  %s1114_s15 = smov (!%p192_p4, %s806_s15), 63  ;;  %v936_v2 = vld [vmem:[%s1107_s1] sm:$0xff]   ;;  %vm355_vm0 = vcmask 392192  }
   0xd   : > { %866 = vmatprep.subr.bf16.mxu0 %v934_v0  ;;  %904 = vmatprep.subr.bf16.mxu1 %v934_v0  ;;  %s807_s20 = sshll.u32 %s1114_s15, 2  ;;  %s809_s24 = sshll.u32 %s1114_s15, 3 }
   0xe   : > { %867 = vmatpush3.bf16.msra.mxu0 %v934_v0  ;;  %907 = vmatpush3.bf16.msra.mxu1 %v934_v0  ;;  %s1025_s23 = scalar_lea.vmem %s1106_s0, %s807_s20  ;;  %s1063_s27 = scalar_lea.vmem %s1108_s2, %s809_s24 }
   0xf   : > { %868 = vmatprep.subr.bf16.mxu0 %v935_v1  ;;  %905 = vmatprep.subr.bf16.mxu1 %v935_v1  ;;  %v937_v3 = vld [vmem:[%s1025_s23] sm:$0xff]   ;;  %v939_v5 = vld [vmem:[%s1025_s23 + $0x8] sm:$0xff]   ;;  %v941_v7 = vld [vmem:[%s1025_s23 + $0x10] sm:$0xff]  }
  0x10   : > { %v938_v4 = vld [vmem:[%s1025_s23 + $0x40] sm:$0xff]   ;;  %872 = vmatprep.mubr.msk.bf16.mxu0 %vm355_vm0, %v937_v3  ;;  %v940_v6 = vld [vmem:[%s1025_s23 + $0x48] sm:$0xff]   ;;  %v942_v8 = vld [vmem:[%s1025_s23 + $0x50] sm:$0xff]  }
  0x11   : > { %888 = vmatprep.mubr.msk.bf16.mxu1 %vm355_vm0, %v938_v4  ;;  %v943_v9 = vld [vmem:[%s1025_s23 + $0x18] sm:$0xff]   ;;  %v945_v11 = vld [vmem:[%s1025_s23 + $0x20] sm:$0xff]   ;;  %v947_v13 = vld [vmem:[%s1025_s23 + $0x28] sm:$0xff]  }
  0x12   : > { %869 = vmatpush3.bf16.msra.mxu0 %v935_v1  ;;  %908 = vmatpush3.bf16.msra.mxu1 %v935_v1  ;;  %v944_v10 = vld [vmem:[%s1025_s23 + $0x58] sm:$0xff]   ;;  %v946_v12 = vld [vmem:[%s1025_s23 + $0x60] sm:$0xff]   ;;  %v948_v14 = vld [vmem:[%s1025_s23 + $0x68] sm:$0xff]  }
  0x13   : > { %870 = vmatprep.subr.bf16.mxu0 %v936_v2  ;;  %906 = vmatprep.subr.bf16.mxu1 %v936_v2  ;;  %v949_v15 = vld [vmem:[%s1025_s23 + $0x30] sm:$0xff]   ;;  %v951_v17 = vld [vmem:[%s1025_s23 + $0x38] sm:$0xff]  }
  0x14   : > { %v950_v16 = vld [vmem:[%s1025_s23 + $0x70] sm:$0xff]   ;;  %v952_v18 = vld [vmem:[%s1025_s23 + $0x78] sm:$0xff]  }
  0x16   : > { %871 = vmatpush3.bf16.msra.mxu0 %v936_v2  ;;  %909 = vmatpush3.bf16.msra.mxu1 %v936_v2 }
  0x19   : > { %873 = vmatmul.mubr.msk.bf16.vlgmr.msra.gmra.mxu0 %vm355_vm0, %v939_v5  ;;  %889 = vmatmul.mubr.msk.bf16.vlgmr.msra.gmra.mxu1 %vm355_vm0, %v940_v6 }
  0x1a   : > { %876 = vmatprep.mubr.msk.bf16.mxu0 %vm355_vm0, %v941_v7  ;;  %892 = vmatprep.mubr.msk.bf16.mxu1 %vm355_vm0, %v942_v8 }
  0x21   : > { %877 = vmatmul.mubr.msk.bf16.gmra.mxu0 %vm355_vm0, %v943_v9  ;;  %893 = vmatmul.mubr.msk.bf16.gmra.mxu1 %vm355_vm0, %v944_v10 }
  0x22   : > { %880 = vmatprep.mubr.msk.bf16.mxu0 %vm355_vm0, %v945_v11  ;;  %896 = vmatprep.mubr.msk.bf16.mxu1 %vm355_vm0, %v946_v12 }
  0x29   : > { %881 = vmatmul.mubr.msk.bf16.gmra.mxu0 %vm355_vm0, %v947_v13  ;;  %897 = vmatmul.mubr.msk.bf16.gmra.mxu1 %vm355_vm0, %v948_v14 }
  0x2a   : > { %884 = vmatprep.mubr.msk.bf16.mxu0 %vm355_vm0, %v949_v15  ;;  %900 = vmatprep.mubr.msk.bf16.mxu1 %vm355_vm0, %v950_v16 }
  0x31   : > { %885 = vmatmul.mubr.msk.bf16.gmra.mxu0 %vm355_vm0, %v951_v17  ;;  %901 = vmatmul.mubr.msk.bf16.gmra.mxu1 %vm355_vm0, %v952_v18 }
  0xd9   : > { %v874_v19 = vpop.f32.mrf.mxu0  ;;  %v890_v20 = vpop.f32.mrf.mxu1 }
  0xda   : > { %571 = vst [vmem:[%s1063_s27 + $0x10] sm:$0xff] %v874_v19  ;;  %587 = vst [vmem:[%s1063_s27 + $0x90] sm:$0xff] %v890_v20 }
  0xdb   : > { %v438_v21 = vpop.f32.mrf.mxu0  ;;  %v502_v22 = vpop.f32.mrf.mxu1 }
  0xdc   : > { %569 = vst [vmem:[%s1063_s27] sm:$0xff] %v438_v21  ;;  %585 = vst [vmem:[%s1063_s27 + $0x80] sm:$0xff] %v502_v22 }
  0xdd   : > { %v875_v23 = vpop.f32.mrf.mxu0  ;;  %v891_v24 = vpop.f32.mrf.mxu1 }
  0xde   : > { %572 = vst [vmem:[%s1063_s27 + $0x18] sm:$0xff] %v875_v23  ;;  %588 = vst [vmem:[%s1063_s27 + $0x98] sm:$0xff] %v891_v24 }
  0xdf   : > { %v441_v25 = vpop.f32.mrf.mxu0  ;;  %v505_v26 = vpop.f32.mrf.mxu1 }
  0xe0   : > { %570 = vst [vmem:[%s1063_s27 + $0x8] sm:$0xff] %v441_v25  ;;  %586 = vst [vmem:[%s1063_s27 + $0x88] sm:$0xff] %v505_v26 }
  0xe1   : > { %v878_v27 = vpop.f32.mrf.mxu0  ;;  %v894_v28 = vpop.f32.mrf.mxu1 }
  0xe2   : > { %575 = vst [vmem:[%s1063_s27 + $0x30] sm:$0xff] %v878_v27  ;;  %591 = vst [vmem:[%s1063_s27 + $0xb0] sm:$0xff] %v894_v28 }
  0xe3   : > { %v454_v29 = vpop.f32.mrf.mxu0  ;;  %v518_v30 = vpop.f32.mrf.mxu1 }
  0xe4   : > { %573 = vst [vmem:[%s1063_s27 + $0x20] sm:$0xff] %v454_v29  ;;  %589 = vst [vmem:[%s1063_s27 + $0xa0] sm:$0xff] %v518_v30 }
  0xe5   : > { %v879_v31 = vpop.f32.mrf.mxu0  ;;  %v895_v32 = vpop.f32.mrf.mxu1 }
  0xe6   : > { %576 = vst [vmem:[%s1063_s27 + $0x38] sm:$0xff] %v879_v31  ;;  %592 = vst [vmem:[%s1063_s27 + $0xb8] sm:$0xff] %v895_v32 }
  0xe7   : > { %v457_v33 = vpop.f32.mrf.mxu0  ;;  %v521_v34 = vpop.f32.mrf.mxu1 }
  0xe8   : > { %574 = vst [vmem:[%s1063_s27 + $0x28] sm:$0xff] %v457_v33  ;;  %590 = vst [vmem:[%s1063_s27 + $0xa8] sm:$0xff] %v521_v34 }
  0xe9   : > { %v882_v35 = vpop.f32.mrf.mxu0  ;;  %v898_v36 = vpop.f32.mrf.mxu1 }
  0xea   : > { %579 = vst [vmem:[%s1063_s27 + $0x50] sm:$0xff] %v882_v35  ;;  %595 = vst [vmem:[%s1063_s27 + $0xd0] sm:$0xff] %v898_v36 }
  0xeb   : > { %v470_v37 = vpop.f32.mrf.mxu0  ;;  %v534_v38 = vpop.f32.mrf.mxu1 }
  0xec   : > { %577 = vst [vmem:[%s1063_s27 + $0x40] sm:$0xff] %v470_v37  ;;  %593 = vst [vmem:[%s1063_s27 + $0xc0] sm:$0xff] %v534_v38 }
  0xed   : > { %v883_v39 = vpop.f32.mrf.mxu0  ;;  %v899_v40 = vpop.f32.mrf.mxu1 }
  0xee   : > { %580 = vst [vmem:[%s1063_s27 + $0x58] sm:$0xff] %v883_v39  ;;  %596 = vst [vmem:[%s1063_s27 + $0xd8] sm:$0xff] %v899_v40 }
  0xef   : > { %v473_v41 = vpop.f32.mrf.mxu0  ;;  %v537_v42 = vpop.f32.mrf.mxu1 }
  0xf0   : > { %578 = vst [vmem:[%s1063_s27 + $0x48] sm:$0xff] %v473_v41  ;;  %594 = vst [vmem:[%s1063_s27 + $0xc8] sm:$0xff] %v537_v42 }
  0xf1   : > { %v886_v43 = vpop.f32.mrf.mxu0  ;;  %v902_v44 = vpop.f32.mrf.mxu1 }
  0xf2   : > { %583 = vst [vmem:[%s1063_s27 + $0x70] sm:$0xff] %v886_v43  ;;  %599 = vst [vmem:[%s1063_s27 + $0xf0] sm:$0xff] %v902_v44 }
  0xf3   : > { %v486_v45 = vpop.f32.mrf.mxu0  ;;  %v550_v46 = vpop.f32.mrf.mxu1 }
  0xf4   : > { %581 = vst [vmem:[%s1063_s27 + $0x60] sm:$0xff] %v486_v45  ;;  %597 = vst [vmem:[%s1063_s27 + $0xe0] sm:$0xff] %v550_v46 }
  0xf5   : > { %v887_v47 = vpop.f32.mrf.mxu0  ;;  %v903_v48 = vpop.f32.mrf.mxu1 }
  0xf6   : > { %584 = vst [vmem:[%s1063_s27 + $0x78] sm:$0xff] %v887_v47  ;;  %600 = vst [vmem:[%s1063_s27 + $0xf8] sm:$0xff] %v903_v48 }
  0xf7   : > { %v489_v49 = vpop.f32.mrf.mxu0  ;;  %v553_v50 = vpop.f32.mrf.mxu1 }
  0xf8   : > { %582 = vst [vmem:[%s1063_s27 + $0x68] sm:$0xff] %v489_v49  ;;  %598 = vst [vmem:[%s1063_s27 + $0xe8] sm:$0xff] %v553_v50 }
  0xf9 PF: > { %s12_s11 = sadd.s32 1, %s975_s11   ;;  %s1109_s9 = smov %s971_s10 }
  0xfa   : > { %p9_p5 = scmp.ge.s32.totalorder %s12_s11, 4   ;;  %s1110_s10 = smov %s1112_s12 }
  0xfc   :  { %11 = sbr.rel (!%p9_p5) target bundleno = 2 (0x2), region = 69 }

</bundles_post_ra>
